<compile_context>
chip_gen: v6e
topology: v6e:2x2x1
jax: 0.10.0
libtpu: 0.0.40
codegen_flags: <defaults>
</compile_context>

<pallas_src>
import jax
import jax.numpy as jnp
from jax.experimental import pallas as pl
from jax.experimental.pallas import tpu as pltpu


_LANE = 128
_MIN_TILE = 1024                       # tile_n % 1024 == 0  =>  (tile_n//128) % 8 == 0
_TARGET_BLOCK_BYTES = 2 * 1024 * 1024  # ~2 MiB actual VMEM per X buffer (1-4 MiB sweet spot)
_MIN_GRID_STEPS = 8                    # keep the pipeline fed / both v7x TCs busy


def _round_up(x, m):
    return ((x + m - 1) // m) * m


def _choose_tile_n(n, d):
    """Rows per X block for the streaming (multi-tile) path; multiple of 1024."""
    # Lane padding: the last dim of an f32 VMEM block is padded to 128 lanes.
    row_bytes = _round_up(d, _LANE) * 4
    cap = max(_MIN_TILE, (_TARGET_BLOCK_BYTES // row_bytes) // _MIN_TILE * _MIN_TILE)
    # Shrink the tile so the grid has >= _MIN_GRID_STEPS steps when N allows it.
    by_steps = (n // (_MIN_GRID_STEPS * _MIN_TILE)) * _MIN_TILE
    tile = min(cap, max(_MIN_TILE, by_steps))
    # TODO(synk): for very large D add a reduction grid axis over D (plus a VMEM
    # accumulator) instead of relying on a single wide row tile.
    return tile


def _logit_kernel(x_ref, w_ref, b_ref, o_ref):
    x = x_ref[...]                    # (tile_n, D) f32, pipelined from HBM
    w = w_ref[...]                    # (1, D) f32, VMEM-resident across steps
    b = b_ref[0]                      # scalar bias from SMEM
    # VPU multiply + XLU lane-reduce; the kernel is HBM-bound on all chips.
    # TODO(synk): if a v7x bundle dump shows the XLU slot saturated, switch to
    # jnp.dot(x, w.T, preferred_element_type=jnp.float32) (idle MXU, free
    # vector-extended slot) so only the final lane-dense relayout stays on XLU.
    z = jnp.sum(x * w, axis=-1)       # (tile_n,)
    # Lane-dense store: logical row i -> slab position (i // 128, i % 128).
    z = z.reshape(o_ref.shape) + b
    o_ref[...] = jax.nn.sigmoid(z).astype(o_ref.dtype)


def _call(x, w, b, tile_n, num_tiles):
    n_rows, d = x.shape
    slab_rows = num_tiles * (tile_n // _LANE)
    return pl.pallas_call(
        _logit_kernel,
        out_shape=jax.ShapeDtypeStruct((slab_rows, _LANE), jnp.float32),
        grid=(num_tiles,),
        in_specs=[
            # X: the only real HBM stream, ~2 MiB double-buffered row tiles.
            # TODO(synk): sweep pipeline_mode=pl.Buffered(3) on this spec; keep
            # the 2-deep default unless a measured win shows up.
            pl.BlockSpec((tile_n, d), lambda i: (i, 0)),
            pl.BlockSpec((1, d), lambda i: (0, 0)),               # W: VMEM-resident
            pl.BlockSpec(memory_space=pltpu.MemorySpace.SMEM),    # b: scalar in SMEM
        ],
        out_specs=pl.BlockSpec((tile_n // _LANE, _LANE), lambda i: (i, 0)),
        compiler_params=pltpu.CompilerParams(
            dimension_semantics=("parallel",),
        ),
        cost_estimate=pl.CostEstimate(
            flops=2 * n_rows * d,
            transcendentals=n_rows,
            bytes_accessed=4 * (n_rows * d + d + 1 + n_rows),
        ),
    )(x, w, b)


@jax.jit
def logit_forward(x, w, b):
    """x: (N, D) f32, w: (1, D) f32 (PyTorch Linear weight layout), b: (1,) f32
    -> (N, 1) f32 = sigmoid(x @ w.T + b)."""
    N, D = x.shape
    tile_n = _choose_tile_n(N, D)
    # TODO(synk): for D < 128 on v7x, pack k = 128//D logical rows per lane row
    # ((N, D) -> (N//k, k*D) reshape + segmented reduce) to cut the lane-padded
    # VMEM footprint and VPU/XLU work by 128/D; omitted here since the kernel
    # is HBM-bandwidth-bound on current chips.
    if N <= tile_n:
        # Tiny batch: single block.  Pad rows only to the next multiple of 128
        # (never to a full tile) so the lane-dense slab shape exists; the pad
        # touches at most 127 rows of an already-small array.
        n128 = _round_up(N, _LANE)
        if n128 != N:
            x = jnp.pad(x, ((0, n128 - N), (0, 0)))
        out_slab = _call(x, w, b, n128, 1)
        total = n128
    else:
        # Streaming path: no padded copy of X.  The last block may read past
        # the end of X; those garbage rows produce garbage slab entries >= N
        # which are sliced off below.
        num_tiles = pl.cdiv(N, tile_n)
        out_slab = _call(x, w, b, tile_n, num_tiles)
        total = num_tiles * tile_n
    # Lane-dense slab -> (N, 1) column, dropping padded / out-of-range rows.
    return out_slab.reshape(total, 1)[:N]


if __name__ == "__main__":
    key = jax.random.PRNGKey(0)
    kx, kw, kb = jax.random.split(key, 3)

    # Case 1: batch=8, input_dim=32 (single-tile path), PyTorch-Linear-style init.
    N, D = 8, 32
    x = jax.random.normal(kx, (N, D), dtype=jnp.float32)
    bound = 1.0 / (D ** 0.5)
    w = jax.random.uniform(kw, (1, D), dtype=jnp.float32, minval=-bound, maxval=bound)
    b = jax.random.uniform(kb, (1,), dtype=jnp.float32, minval=-bound, maxval=bound)
    out = logit_forward(x, w, b)
    jax.block_until_ready(out)
    ref = jax.nn.sigmoid(x @ w.T + b)
    assert out.shape == (N, 1), out.shape
    assert jnp.allclose(out, ref, atol=1e-5), "mismatch vs reference (case 1)"

    # Case 2: N not a multiple of 128 (pad-to-128 single-tile path).
    N2, D2 = 300, 64
    x2 = jax.random.normal(kx, (N2, D2), dtype=jnp.float32)
    bound2 = 1.0 / (D2 ** 0.5)
    w2 = jax.random.uniform(kw, (1, D2), dtype=jnp.float32, minval=-bound2, maxval=bound2)
    out2 = logit_forward(x2, w2, b)
    jax.block_until_ready(out2)
    ref2 = jax.nn.sigmoid(x2 @ w2.T + b)
    assert out2.shape == (N2, 1), out2.shape
    assert jnp.allclose(out2, ref2, atol=1e-5), "mismatch vs reference (case 2)"

    # Case 3: multi-tile streaming path with a partial last block (no X pad).
    N3, D3 = 2600, 48
    x3 = jax.random.normal(kx, (N3, D3), dtype=jnp.float32)
    bound3 = 1.0 / (D3 ** 0.5)
    w3 = jax.random.uniform(kw, (1, D3), dtype=jnp.float32, minval=-bound3, maxval=bound3)
    out3 = logit_forward(x3, w3, b)
    jax.block_until_ready(out3)
    ref3 = jax.nn.sigmoid(x3 @ w3.T + b)
    assert out3.shape == (N3, 1), out3.shape
    assert jnp.allclose(out3, ref3, atol=1e-5), "mismatch vs reference (case 3)"

    print("KERNEL_OK")
</pallas_src>

<mosaic_0001>
module attributes {stable_mosaic.version = 11 : i64} {
  func.func @_logit_kernel(%arg0: i32, %arg1: memref<128x32xf32, #tpu.memory_space<vmem>>, %arg2: memref<1x32xf32, #tpu.memory_space<vmem>>, %arg3: memref<1xf32, #tpu.memory_space<smem>>, %arg4: memref<1x128xf32, #tpu.memory_space<vmem>>) attributes {dimension_semantics = [#tpu.dimension_semantics<parallel>], iteration_bounds = array<i64: 1>, scalar_prefetch = 0 : i64, scratch_operands = 0 : i64, tpu.core_type = #tpu.core_type<tc>, window_params = [{transform_indices = @transform_0, window_bounds = array<i64: 128, 32>}, {pipeline_mode = #tpu.pipeline_mode<synchronous>, transform_indices = @transform_1, window_bounds = array<i64: 1, 32>}, {transform_indices = @transform_2, window_bounds = array<i64: 1>}, {transform_indices = @transform_3, window_bounds = array<i64: 1, 128>}]} {
    %c0 = arith.constant 0 : index
    %c0_0 = arith.constant 0 : index
    %0 = vector.load %arg1[%c0, %c0_0] : memref<128x32xf32, #tpu.memory_space<vmem>>, vector<128x32xf32>
    %c0_1 = arith.constant 0 : index
    %c0_2 = arith.constant 0 : index
    %1 = vector.load %arg2[%c0_1, %c0_2] : memref<1x32xf32, #tpu.memory_space<vmem>>, vector<1x32xf32>
    %c0_3 = arith.constant 0 : index
    %2 = memref.load %arg3[%c0_3] : memref<1xf32, #tpu.memory_space<smem>>
    %3 = vector.broadcast %1 : vector<1x32xf32> to vector<128x32xf32>
    %4 = arith.mulf %0, %3 : vector<128x32xf32>
    %cst = arith.constant dense<0.000000e+00> : vector<128xf32>
    %5 = vector.multi_reduction <add>, %4, %cst [1] : vector<128x32xf32> to vector<128xf32>
    %6 = vector.shape_cast %5 : vector<128xf32> to vector<1x128xf32>
    %7 = vector.broadcast %2 : f32 to vector<1x128xf32>
    %8 = arith.addf %6, %7 : vector<1x128xf32>
    %9 = arith.negf %8 : vector<1x128xf32>
    %10 = math.exp %9 : vector<1x128xf32>
    %cst_4 = arith.constant 1.000000e+00 : f32
    %11 = vector.broadcast %cst_4 : f32 to vector<1x128xf32>
    %12 = arith.addf %11, %10 : vector<1x128xf32>
    %13 = arith.divf %11, %12 : vector<1x128xf32>
    %c0_5 = arith.constant 0 : index
    %c0_6 = arith.constant 0 : index
    %14 = vector.load %arg4[%c0_5, %c0_6] : memref<1x128xf32, #tpu.memory_space<vmem>>, vector<1x128xf32>
    tpu.vector_store %arg4[%c0_5, %c0_6], %13 {strides = array<i32>} : memref<1x128xf32, #tpu.memory_space<vmem>>, vector<1x128xf32>,
    return
  }
  func.func @transform_0(%arg0: i32) -> (i32, i32) {
    %c0_i32 = arith.constant 0 : i32
    %c0_i32_0 = arith.constant 0 : i32
    return %arg0, %c0_i32 : i32, i32
  }
  func.func @transform_1(%arg0: i32) -> (i32, i32) {
    %c0_i32 = arith.constant 0 : i32
    %c0_i32_0 = arith.constant 0 : i32
    %c0_i32_1 = arith.constant 0 : i32
    return %c0_i32, %c0_i32_0 : i32, i32
  }
  func.func @transform_2(%arg0: i32) -> i32 {
    %c0_i32 = arith.constant 0 : i32
    %c0_i32_0 = arith.constant 0 : i32
    return %c0_i32 : i32
  }
  func.func @transform_3(%arg0: i32) -> (i32, i32) {
    %c0_i32 = arith.constant 0 : i32
    %c0_i32_0 = arith.constant 0 : i32
    return %arg0, %c0_i32 : i32, i32
  }
}

</mosaic_0001>

<bundles_post_ra>
// kernel: logit_forward.1
= control target key start
LH: loop header
LB: loop body
LE: loop exit
PB: predicated region body
PF: predicated region fallthrough
CT: control target
= control target key end

     0   :  { %vm55_vm0 = vcmask 261120   ;;  %vm244_vm1 = vcmask 130112   ;;  %vm251_vm2 = vcmask 195712   ;;  %vm258_vm3 = vcmask 261312   ;;  %s580_s0 = inlined_call_operand.vmem [shape: f32[128,32], index: 0, kind: input, shape index: {}]   ;;  %s581_s1 = inlined_call_operand.vmem [shape: f32[1,32], index: 1, kind: input, shape index: {}]   ;;  %s582_s2 = inlined_call_operand.<no memory space> [shape: f32[1], index: 2, kind: input, shape index: {}]   ;;  %s583_s3 = inlined_call_operand.vmem [shape: f32[1,128], index: 3, kind: output, shape index: {}]  }
   0x1   :  { %v15_v0 = vld [vmem:[%s580_s0] sm:$0xff]  ;;  %v17_v2 = vld [vmem:[%s580_s0 + $0x10] sm:$0xff]  ;;  %v16_v5 = vld [vmem:[%s580_s0 + $0x8] sm:$0xff]  ;;  %v521_v49 = vstv %s582_s2  ;;  %vm265_vm4 = vcmask 326912   ;;  %vm272_vm5 = vcmask 392512   ;;  %vm279_vm6 = vcmask 458112  }
   0x2   :  { %v350_v1 = vld [vmem:[%s581_s1] ss:$0 sm:$0xff]  ;;  %v18_v6 = vld [vmem:[%s580_s0 + $0x18] sm:$0xff]  ;;  %v20_v10 = vld [vmem:[%s580_s0 + $0x28] sm:$0xff]  ;;  %vm286_vm7 = vcmask 523712   ;;  %vm293_vm8 = vcmask 589312  }
   0x3   :  { %v39_v3 = vmul.f32 %v350_v1, %v15_v0  ;;  %v41_v4 = vmul.f32 %v350_v1, %v17_v2  ;;  %v40_v7 = vmul.f32 %v350_v1, %v16_v5  ;;  %v42_v8 = vmul.f32 %v350_v1, %v18_v6  ;;  %v19_v9 = vld [vmem:[%s580_s0 + $0x20] sm:$0xff]  ;;  %v21_v17 = vld [vmem:[%s580_s0 + $0x30] sm:$0xff]  ;;  %v22_v18 = vld [vmem:[%s580_s0 + $0x38] sm:$0xff] }
   0x4   :  { %v43_v15 = vmul.f32 %v350_v1, %v19_v9  ;;  %v44_v16 = vmul.f32 %v350_v1, %v20_v10  ;;  %v45_v21 = vmul.f32 %v350_v1, %v21_v17  ;;  %v46_v22 = vmul.f32 %v350_v1, %v22_v18  ;;  %v23_v23 = vld [vmem:[%s580_s0 + $0x40] sm:$0xff]  ;;  %v24_v24 = vld [vmem:[%s580_s0 + $0x48] sm:$0xff]  ;;  %v25_v29 = vld [vmem:[%s580_s0 + $0x50] sm:$0xff] }
   0x5   :  { %v56_v11 = vsel %vm55_vm0, %v39_v3, 0.0  ;;  %v62_v12 = vsel %vm55_vm0, %v41_v4, 0.0  ;;  %v59_v13 = vsel %vm55_vm0, %v40_v7, 0.0  ;;  %v65_v14 = vsel %vm55_vm0, %v42_v8, 0.0  ;;  %v26_v30 = vld [vmem:[%s580_s0 + $0x58] sm:$0xff]  ;;  %v27_v35 = vld [vmem:[%s580_s0 + $0x60] sm:$0xff] }
   0x6   :  { %57 = vadd.xlane.f32.xlu0 %v56_v11  ;;  %63 = vadd.xlane.f32.xlu1 %v62_v12  ;;  %v68_v19 = vsel %vm55_vm0, %v43_v15, 0.0  ;;  %v71_v20 = vsel %vm55_vm0, %v44_v16, 0.0  ;;  %v74_v25 = vsel %vm55_vm0, %v45_v21, 0.0  ;;  %v77_v26 = vsel %vm55_vm0, %v46_v22, 0.0  ;;  %v28_v36 = vld [vmem:[%s580_s0 + $0x68] sm:$0xff]  ;;  %v29_v41 = vld [vmem:[%s580_s0 + $0x70] sm:$0xff] }
   0x7   :  { %v47_v27 = vmul.f32 %v350_v1, %v23_v23  ;;  %v48_v28 = vmul.f32 %v350_v1, %v24_v24  ;;  %v49_v33 = vmul.f32 %v350_v1, %v25_v29  ;;  %v50_v34 = vmul.f32 %v350_v1, %v26_v30  ;;  %v30_v42 = vld [vmem:[%s580_s0 + $0x78] sm:$0xff] }
   0x8   :  { %v51_v39 = vmul.f32 %v350_v1, %v27_v35  ;;  %v52_v40 = vmul.f32 %v350_v1, %v28_v36  ;;  %v53_v45 = vmul.f32 %v350_v1, %v29_v41  ;;  %v54_v46 = vmul.f32 %v350_v1, %v30_v42 }
   0x9   :  { %v80_v31 = vsel %vm55_vm0, %v47_v27, 0.0  ;;  %v83_v32 = vsel %vm55_vm0, %v48_v28, 0.0  ;;  %v86_v37 = vsel %vm55_vm0, %v49_v33, 0.0  ;;  %v89_v38 = vsel %vm55_vm0, %v50_v34, 0.0 }
   0xa   :  { %60 = vadd.xlane.f32.xlu0 %v59_v13  ;;  %66 = vadd.xlane.f32.xlu1 %v65_v14  ;;  %v92_v43 = vsel %vm55_vm0, %v51_v39, 0.0  ;;  %v95_v44 = vsel %vm55_vm0, %v52_v40, 0.0  ;;  %v98_v47 = vsel %vm55_vm0, %v53_v45, 0.0  ;;  %v101_v48 = vsel %vm55_vm0, %v54_v46, 0.0 }
   0xb   :  { %vm300_vm9 = vcmask 654912   ;;  %vm307_vm10 = vcmask 720512   ;;  %vm314_vm11 = vcmask 786112   ;;  %vm321_vm12 = vcmask 851712  }
   0xc   :  { %vm328_vm13 = vcmask 917312   ;;  %vm335_vm14 = vcmask 982912   ;;  %vm342_vm15 = vcmask 1048512  }
   0xe   :  { %69 = vadd.xlane.f32.xlu0 %v68_v19  ;;  %72 = vadd.xlane.f32.xlu1 %v71_v20 }
  0x12   :  { %75 = vadd.xlane.f32.xlu0 %v74_v25  ;;  %78 = vadd.xlane.f32.xlu1 %v77_v26  ;;  %v233_v25 = vlaneseq }
  0x14   :  { %v537_v36 = vand.u32 127, %v233_v25 }
  0x16   :  { %81 = vadd.xlane.f32.xlu0 %v80_v31  ;;  %84 = vadd.xlane.f32.xlu1 %v83_v32 }
  0x1a   :  { %87 = vadd.xlane.f32.xlu0 %v86_v37  ;;  %90 = vadd.xlane.f32.xlu1 %v89_v38 }
  0x1e   :  { %93 = vadd.xlane.f32.xlu0 %v92_v43  ;;  %96 = vadd.xlane.f32.xlu1 %v95_v44 }
  0x22   :  { %99 = vadd.xlane.f32.xlu0 %v98_v47  ;;  %102 = vadd.xlane.f32.xlu1 %v101_v48  ;;  %v541_v47 = vshrl.u32 %v233_v25, 7  ;;  %v246_v48 = vadd.s32 4294967280, %v537_v36 }
  0x8f   :  { %v58_v50 = vpop.xlane.xlu0 %57  ;;  %v64_v51 = vpop.xlane.xlu1 %63 }
  0x90   :  { %v105_v52 = vadd.f32 %v521_v49, %v58_v50  ;;  %v107_v53 = vadd.f32 %v521_v49, %v64_v51  ;;  %v239_v51 = vadd.s32 4294967288, %v537_v36 }
  0x92   :  { %v351_v54 = vmul.f32 -1.442695, %v105_v52  ;;  %v353_v55 = vmul.f32 -1.442695, %v107_v53 }
  0x93   :  { %v61_v56 = vpop.xlane.xlu0 %60  ;;  %v67_v57 = vpop.xlane.xlu1 %66 }
  0x94   :  { %367 = vpow2.f32 %v351_v54  ;;  %v106_v58 = vadd.f32 %v521_v49, %v61_v56  ;;  %v108_v59 = vadd.f32 %v521_v49, %v67_v57  ;;  %v253_v54 = vadd.s32 4294967272, %v537_v36 }
  0x95   :  { %369 = vpow2.f32 %v353_v55 }
  0x96   :  { %v352_v60 = vmul.f32 -1.442695, %v106_v58  ;;  %v354_v61 = vmul.f32 -1.442695, %v108_v59  ;;  %v237_v59 = vsub.s32 %v537_v36, %v541_v47 }
  0x97   :  { %v70_v62 = vpop.xlane.xlu0 %69  ;;  %v73_v63 = vpop.xlane.xlu1 %72 }
  0x98   :  { %371 = vpow2.f32 %v352_v60  ;;  %v109_v0 = vadd.f32 %v521_v49, %v70_v62  ;;  %v110_v1 = vadd.f32 %v521_v49, %v73_v63  ;;  %v242_v60 = vsub.s32 %v239_v51, %v541_v47 }
  0x99   :  { %373 = vpow2.f32 %v354_v61  ;;  %v249_v62 = vsub.s32 %v246_v48, %v541_v47  ;;  %v256_v63 = vsub.s32 %v253_v54, %v541_v47 }
  0x9a   :  { %v355_v2 = vmul.f32 -1.442695, %v109_v0  ;;  %v356_v3 = vmul.f32 -1.442695, %v110_v1 }
  0x9b   :  { %v76_v4 = vpop.xlane.xlu0 %75  ;;  %v79_v5 = vpop.xlane.xlu1 %78 }
  0x9c   :  { %375 = vpow2.f32 %v355_v2  ;;  %v111_v6 = vadd.f32 %v521_v49, %v76_v4  ;;  %v112_v7 = vadd.f32 %v521_v49, %v79_v5  ;;  %v267_v4 = vadd.s32 4294967256, %v537_v36 }
  0x9d   :  { %377 = vpow2.f32 %v356_v3 }
  0x9e   :  { %v357_v8 = vmul.f32 -1.442695, %v111_v6  ;;  %v358_v9 = vmul.f32 -1.442695, %v112_v7 }
  0x9f   :  { %v82_v10 = vpop.xlane.xlu0 %81  ;;  %v85_v11 = vpop.xlane.xlu1 %84 }
  0xa0   :  { %379 = vpow2.f32 %v357_v8  ;;  %v113_v12 = vadd.f32 %v521_v49, %v82_v10  ;;  %v114_v13 = vadd.f32 %v521_v49, %v85_v11 }
  0xa1   :  { %v368_v14 = vpop.eup %367  ;;  %381 = vpow2.f32 %v358_v9  ;;  %v274_v9 = vadd.s32 4294967248, %v537_v36 }
  0xa2   :  { %v370_v15 = vpop.eup %369  ;;  %v169_v16 = vadd.f32 1.0, %v368_v14  ;;  %v359_v17 = vmul.f32 -1.442695, %v113_v12  ;;  %v360_v19 = vmul.f32 -1.442695, %v114_v13 }
  0xa3   :  { %v171_v18 = vadd.f32 1.0, %v370_v15  ;;  %v88_v20 = vpop.xlane.xlu0 %87  ;;  %v91_v21 = vpop.xlane.xlu1 %90 }
  0xa4   :  { %383 = vrcp.f32 %v169_v16  ;;  %v115_v22 = vadd.f32 %v521_v49, %v88_v20  ;;  %v116_v23 = vadd.f32 %v521_v49, %v91_v21 }
  0xa5   :  { %v372_v24 = vpop.eup %371  ;;  %385 = vrcp.f32 %v171_v18  ;;  %v270_v18 = vsub.s32 %v267_v4, %v541_v47  ;;  %v337_v4 = vadd.s32 4294967176, %v537_v36 }
  0xa6   :  { %v374_v26 = vpop.eup %373  ;;  %v170_v27 = vadd.f32 1.0, %v372_v24  ;;  %387 = vpow2.f32 %v359_v17  ;;  %v361_v28 = vmul.f32 -1.442695, %v115_v22  ;;  %v362_v30 = vmul.f32 -1.442695, %v116_v23 }
  0xa7   :  { %v172_v29 = vadd.f32 1.0, %v374_v26  ;;  %389 = vpow2.f32 %v360_v19  ;;  %v94_v31 = vpop.xlane.xlu0 %93  ;;  %v97_v32 = vpop.xlane.xlu1 %96  ;;  %v281_v19 = vadd.s32 4294967240, %v537_v36  ;;  %v277_v23 = vsub.s32 %v274_v9, %v541_v47 }
  0xa8   :  { %391 = vrcp.f32 %v170_v27  ;;  %v117_v33 = vadd.f32 %v521_v49, %v94_v31  ;;  %v118_v34 = vadd.f32 %v521_v49, %v97_v32  ;;  %v288_v27 = vadd.s32 4294967232, %v537_v36 }
  0xa9   :  { %v376_v35 = vpop.eup %375  ;;  %393 = vrcp.f32 %v172_v29  ;;  %v284_v32 = vsub.s32 %v281_v19, %v541_v47 }
  0xaa   :  { %v378_v37 = vpop.eup %377  ;;  %v173_v38 = vadd.f32 1.0, %v376_v35  ;;  %395 = vpow2.f32 %v361_v28  ;;  %v363_v39 = vmul.f32 -1.442695, %v117_v33  ;;  %v364_v41 = vmul.f32 -1.442695, %v118_v34 }
  0xab   :  { %v174_v40 = vadd.f32 1.0, %v378_v37  ;;  %397 = vpow2.f32 %v362_v30  ;;  %v100_v42 = vpop.xlane.xlu0 %99  ;;  %v103_v43 = vpop.xlane.xlu1 %102  ;;  %v295_v28 = vadd.s32 4294967224, %v537_v36 }
  0xac   :  { %399 = vrcp.f32 %v173_v38  ;;  %v119_v44 = vadd.f32 %v521_v49, %v100_v42  ;;  %v120_v45 = vadd.f32 %v521_v49, %v103_v43  ;;  %v260_v49 = vadd.s32 4294967264, %v537_v36 }
  0xad   :  { %v380_v46 = vpop.eup %379  ;;  %401 = vrcp.f32 %v174_v40  ;;  %v291_v40 = vsub.s32 %v288_v27, %v541_v47  ;;  %v302_v42 = vadd.s32 4294967216, %v537_v36 }
  0xae   :  { %v382_v50 = vpop.eup %381  ;;  %v175_v52 = vadd.f32 1.0, %v380_v46  ;;  %403 = vpow2.f32 %v363_v39  ;;  %v365_v53 = vmul.f32 -1.442695, %v119_v44  ;;  %v366_v56 = vmul.f32 -1.442695, %v120_v45 }
  0xaf   :  { %v176_v55 = vadd.f32 1.0, %v382_v50  ;;  %405 = vpow2.f32 %v364_v41  ;;  %v263_v3 = vsub.s32 %v260_v49, %v541_v47  ;;  %v298_v41 = vsub.s32 %v295_v28, %v541_v47 }
  0xb0   :  { %407 = vrcp.f32 %v175_v52  ;;  %v309_v46 = vadd.s32 4294967208, %v537_v36  ;;  %v305_v54 = vsub.s32 %v302_v42, %v541_v47 }
  0xb1   :  { %v384_v57 = vpop.eup %383  ;;  %409 = vrcp.f32 %v176_v55  ;;  %v316_v55 = vadd.s32 4294967200, %v537_v36 }
  0xb2   :  { %v386_v58 = vpop.eup %385  ;;  %411 = vpow2.f32 %v365_v53  ;;  %v238_v7 = vrot.slane %v384_v57, %v237_v59  ;;  %v312_v49 = vsub.s32 %v309_v46, %v541_v47 }
  0xb3   :  { %v388_v61 = vpop.eup %387  ;;  %413 = vpow2.f32 %v366_v56  ;;  %v250_v11 = vrot.slane %v386_v58, %v249_v62  ;;  %v323_v58 = vadd.s32 4294967192, %v537_v36 }
  0xb4   :  { %v390_v0 = vpop.eup %389  ;;  %v177_v1 = vadd.f32 1.0, %v388_v61 }
  0xb5   :  { %v392_v2 = vpop.eup %391  ;;  %v178_v5 = vadd.f32 1.0, %v390_v0  ;;  %v330_v0 = vadd.s32 4294967184, %v537_v36 }
  0xb6   :  { %v394_v6 = vpop.eup %393  ;;  %v243_v8 = vrot.slane %v392_v2, %v242_v60  ;;  %415 = vrcp.f32 %v177_v1 }
  0xb7   :  { %v396_v10 = vpop.eup %395  ;;  %v257_v12 = vrot.slane %v394_v6, %v256_v63  ;;  %417 = vrcp.f32 %v178_v5  ;;  %v319_v63 = vsub.s32 %v316_v55, %v541_v47  ;;  %v333_v9 = vsub.s32 %v330_v0, %v541_v47 }
  0xb8   :  { %v398_v13 = vpop.eup %397  ;;  %v245_v14 = vsel %vm244_vm1, %v243_v8, %v238_v7  ;;  %v179_v15 = vadd.f32 1.0, %v396_v10 }
  0xb9   :  { %v400_v16 = vpop.eup %399  ;;  %v252_v17 = vsel %vm251_vm2, %v250_v11, %v245_v14  ;;  %v180_v20 = vadd.f32 1.0, %v398_v13 }
  0xba   :  { %v402_v21 = vpop.eup %401  ;;  %v264_v22 = vrot.slane %v400_v16, %v263_v3  ;;  %419 = vrcp.f32 %v179_v15  ;;  %v259_v25 = vsel %vm258_vm3, %v257_v12, %v252_v17  ;;  %v326_v3 = vsub.s32 %v323_v58, %v541_v47 }
  0xbb   :  { %v404_v24 = vpop.eup %403  ;;  %421 = vrcp.f32 %v180_v20  ;;  %v271_v31 = vrot.slane %v402_v21, %v270_v18  ;;  %v340_v12 = vsub.s32 %v337_v4, %v541_v47 }
  0xbc   :  { %v406_v26 = vpop.eup %405  ;;  %v181_v29 = vadd.f32 1.0, %v404_v24  ;;  %v266_v35 = vsel %vm265_vm4, %v264_v22, %v259_v25 }
  0xbd   :  { %v408_v30 = vpop.eup %407  ;;  %v182_v33 = vadd.f32 1.0, %v406_v26  ;;  %v273_v44 = vsel %vm272_vm5, %v271_v31, %v266_v35 }
  0xbe   :  { %v410_v34 = vpop.eup %409  ;;  %v278_v37 = vrot.slane %v408_v30, %v277_v23  ;;  %423 = vrcp.f32 %v181_v29 }
  0xbf   :  { %v412_v38 = vpop.eup %411  ;;  %425 = vrcp.f32 %v182_v33  ;;  %v285_v45 = vrot.slane %v410_v34, %v284_v32 }
  0xc0   :  { %v414_v39 = vpop.eup %413  ;;  %v183_v43 = vadd.f32 1.0, %v412_v38  ;;  %v280_v50 = vsel %vm279_vm6, %v278_v37, %v273_v44 }
  0xc1   :  { %v184_v48 = vadd.f32 1.0, %v414_v39  ;;  %v287_v56 = vsel %vm286_vm7, %v285_v45, %v280_v50 }
  0xc2   :  { %427 = vrcp.f32 %v183_v43 }
  0xc3   :  { %v416_v51 = vpop.eup %415  ;;  %429 = vrcp.f32 %v184_v48 }
  0xc4   :  { %v418_v52 = vpop.eup %417  ;;  %v292_v53 = vrot.slane %v416_v51, %v291_v40 }
  0xc5   :  { %v299_v57 = vrot.slane %v418_v52, %v298_v41 }
  0xc6   :  { %v294_v59 = vsel %vm293_vm8, %v292_v53, %v287_v56 }
  0xc7   :  { %v420_v60 = vpop.eup %419  ;;  %v301_v1 = vsel %vm300_vm9, %v299_v57, %v294_v59 }
  0xc8   :  { %v422_v61 = vpop.eup %421  ;;  %v306_v62 = vrot.slane %v420_v60, %v305_v54 }
  0xc9   :  { %v313_v2 = vrot.slane %v422_v61, %v312_v49 }
  0xca   :  { %v308_v5 = vsel %vm307_vm10, %v306_v62, %v301_v1 }
  0xcb   :  { %v424_v6 = vpop.eup %423  ;;  %v315_v10 = vsel %vm314_vm11, %v313_v2, %v308_v5 }
  0xcc   :  { %v426_v7 = vpop.eup %425  ;;  %v320_v8 = vrot.slane %v424_v6, %v319_v63 }
  0xcd   :  { %v327_v11 = vrot.slane %v426_v7, %v326_v3 }
  0xce   :  { %v322_v13 = vsel %vm321_vm12, %v320_v8, %v315_v10 }
  0xcf   :  { %v428_v14 = vpop.eup %427  ;;  %v329_v36 = vsel %vm328_vm13, %v327_v11, %v322_v13 }
  0xd0   :  { %v430_v15 = vpop.eup %429  ;;  %v334_v16 = vrot.slane %v428_v14, %v333_v9 }
  0xd1   :  { %v341_v17 = vrot.slane %v430_v15, %v340_v12 }
  0xd2   :  { %v336_v18 = vsel %vm335_vm14, %v334_v16, %v329_v36 }
  0xd3   :  { %v343_v19 = vsel %vm342_vm15, %v341_v17, %v336_v18 }
  0xd4   :  { %345 = vst [vmem:[%s583_s3] sm:$0x1] %v343_v19 }

</bundles_post_ra>
